<compile_context>
chip_gen: v7x
topology: tpu7x:2x2x1
jax: 0.10.0
libtpu: 0.0.40
codegen_flags: <defaults>
</compile_context>

<pallas_src>
import numpy as np
import jax
import jax.numpy as jnp
from jax.experimental import pallas as pl
from jax.experimental.pallas import tpu as pltpu


MIN_DEG = 0
MAX_DEG = 5
HIDDEN_DIM = 128
OUTPUT_DIM = 32                  # synthetic choice for output_dim
IN_DIM = 3                       # bbox has 3 coordinates
N_DEG = MAX_DEG - MIN_DEG        # 5
HALF_PE = IN_DIM * N_DEG         # 15  (sin half; cos half is identical arg)
FEAT_DIM = 2 * HALF_PE + IN_DIM  # 33  (= 6*(max_deg-min_deg)+3)
LANE = 128


def _round_up(x, m):
    return -(-x // m) * m


def _choose_tile_b(batch):
    """Batch tile: big enough to fill the MXU M-dim, >=2 grid steps when possible."""
    b8 = _round_up(batch, 8)
    if b8 >= 2048:
        return 512   # multiple of 256 (v6e/v7x MXU) and 128 (v5e); many steps
    if b8 >= 512:
        return 256   # multiple of 256; >=2 grid steps
    if b8 >= 256:
        return 128   # keep >=2 grid steps for v7x's two TensorCores
    return b8        # tiny batch: single tile, sublane-aligned


def bbox_kernel(x_ref, m_ref, w1s_ref, w1c_ref, w1x_ref, b1_ref,
                w2_ref, b2_ref, o_ref):
    """One batch tile: normalize -> PE (sin/cos) -> Linear -> ReLU -> Linear."""
    x = x_ref[...].astype(jnp.float32)                       # (TB, 3)
    # x = x / sum(x, -1, keepdim=True)   (matches PyTorch reference exactly;
    # no zero-sum guard, same as the reference)
    x_norm = x / jnp.sum(x, axis=-1, keepdims=True)

    # Positional encoding argument (f32 for accuracy of sin/cos): (TB, 15)
    arg = jnp.dot(x_norm, m_ref[...], preferred_element_type=jnp.float32)
    s = jnp.sin(arg)                                          # sin half
    c = jnp.cos(arg)                                          # = sin(arg + pi/2)

    wdt = w1s_ref.dtype                                       # bf16 or f32
    # First Linear on concat([sin, cos, x_norm]) done as split matmuls
    h = (jnp.dot(s.astype(wdt), w1s_ref[...], preferred_element_type=jnp.float32)
         + jnp.dot(c.astype(wdt), w1c_ref[...], preferred_element_type=jnp.float32)
         + jnp.dot(x_norm.astype(wdt), w1x_ref[...], preferred_element_type=jnp.float32)
         + b1_ref[...])
    h = jnp.maximum(h, 0.0)                                   # ReLU

    out = (jnp.dot(h.astype(wdt), w2_ref[...], preferred_element_type=jnp.float32)
           + b2_ref[...])
    o_ref[...] = out.astype(o_ref.dtype)                      # (TB, 128) lane-dense store


def build_pe_matrix(min_deg=MIN_DEG, max_deg=MAX_DEG):
    """M such that (x @ M) == flattened (x[..., None, :] * scales[:, None])."""
    n = max_deg - min_deg
    M = np.zeros((IN_DIM, IN_DIM * n), dtype=np.float32)
    for d in range(n):
        scale = float(2 ** (min_deg + d))
        for cc in range(IN_DIM):
            M[cc, d * IN_DIM + cc] = scale
    return jnp.asarray(M)


def init_params(key, hidden_dim=HIDDEN_DIM, output_dim=OUTPUT_DIM):
    k1, k2, k3, k4, k5 = jax.random.split(key, 5)
    # weights stored (in, out): x @ W + b  ==  PyTorch x @ W.T + b with W=(out,in)
    w1 = jax.random.normal(k1, (FEAT_DIM, hidden_dim), jnp.float32) * 0.1
    b1 = jax.random.normal(k2, (1, hidden_dim), jnp.float32) * 0.01
    w2 = jax.random.normal(k3, (hidden_dim, output_dim), jnp.float32) * 0.1
    b2 = jax.random.normal(k4, (1, output_dim), jnp.float32) * 0.01
    null_cond = jax.random.normal(k5, (output_dim,), jnp.float32)
    return dict(w1=w1, b1=b1, w2=w2, b2=b2, null_cond=null_cond)


def bbox_model_forward(x, params, uncond=False, *, tile_b=None, use_bf16=True):
    """x: (B, 3) float32. Returns (B, output_dim), or null_cond if uncond."""
    if uncond:
        return params["null_cond"]

    B = x.shape[0]
    hidden_dim = params["w1"].shape[1]
    output_dim = params["w2"].shape[1]

    if tile_b is None:
        tile_b = _choose_tile_b(B)
    b_pad = _round_up(B, tile_b)
    n_pad = _round_up(max(output_dim, LANE), LANE)   # lane-dense output width

    # Pad the batch (pad rows with ones so the row-normalization stays finite);
    # padded rows are sliced off below.
    if b_pad != B:
        x = jnp.concatenate(
            [x, jnp.ones((b_pad - B, IN_DIM), x.dtype)], axis=0)

    M = build_pe_matrix()
    wdt = jnp.bfloat16 if use_bf16 else jnp.float32
    w1 = params["w1"].astype(wdt)
    w1s = w1[:HALF_PE]                     # (15, H) sin part
    w1c = w1[HALF_PE:2 * HALF_PE]          # (15, H) cos part
    w1x = w1[2 * HALF_PE:]                 # (3,  H) passthrough part
    b1 = params["b1"].reshape(1, hidden_dim).astype(jnp.float32)
    # Pad the second Linear to a 128-wide (lane-dense) output; extra cols are 0.
    w2 = jnp.zeros((hidden_dim, n_pad), wdt).at[:, :output_dim].set(
        params["w2"].astype(wdt))
    b2 = jnp.zeros((1, n_pad), jnp.float32).at[:, :output_dim].set(
        params["b2"].reshape(1, output_dim).astype(jnp.float32))

    grid = (b_pad // tile_b,)
    full = lambda i: (0, 0)

    out = pl.pallas_call(
        bbox_kernel,
        out_shape=jax.ShapeDtypeStruct((b_pad, n_pad), jnp.float32),
        grid_spec=pltpu.PrefetchScalarGridSpec(
            num_scalar_prefetch=0,
            grid=grid,
            in_specs=[
                pl.BlockSpec((tile_b, IN_DIM), lambda i: (i, 0)),     # x
                pl.BlockSpec((IN_DIM, HALF_PE), full),                # M
                pl.BlockSpec((HALF_PE, hidden_dim), full),            # W1 sin
                pl.BlockSpec((HALF_PE, hidden_dim), full),            # W1 cos
                pl.BlockSpec((IN_DIM, hidden_dim), full),             # W1 x
                pl.BlockSpec((1, hidden_dim), full),                  # b1
                pl.BlockSpec((hidden_dim, n_pad), full),              # W2 (padded)
                pl.BlockSpec((1, n_pad), full),                       # b2 (padded)
            ],
            out_specs=pl.BlockSpec((tile_b, n_pad), lambda i: (i, 0)),
        ),
        compiler_params=pltpu.CompilerParams(
            dimension_semantics=("parallel",)),
    )(x, M, w1s, w1c, w1x, b1, w2, b2)

    return out[:B, :output_dim]


def bbox_model_reference(x, params):
    """Pure-JAX reference matching the PyTorch forward (f32)."""
    x = x / jnp.sum(x, axis=-1, keepdims=True)
    scales = jnp.asarray([2.0 ** i for i in range(MIN_DEG, MAX_DEG)],
                         dtype=jnp.float32)
    x_enc = (x[..., None, :] * scales[:, None]).reshape(x.shape[:-1] + (-1,))
    x_enc = jnp.concatenate([x_enc, x_enc + 0.5 * jnp.pi], axis=-1)
    feat = jnp.concatenate([jnp.sin(x_enc), x], axis=-1)
    h = jnp.maximum(feat @ params["w1"] + params["b1"], 0.0)
    return h @ params["w2"] + params["b2"]


if __name__ == "__main__":
    key = jax.random.PRNGKey(0)
    k_x, k_p = jax.random.split(key)

    B = 16
    x = jax.random.uniform(k_x, (B, IN_DIM), jnp.float32, minval=0.1, maxval=1.0)
    params = init_params(k_p)

    ref = bbox_model_reference(x, params)

    # f32 path: tight check against the reference.
    out_f32 = jax.block_until_ready(
        bbox_model_forward(x, params, use_bf16=False))
    np.testing.assert_allclose(np.asarray(out_f32), np.asarray(ref),
                               rtol=1e-4, atol=1e-4)

    # bf16-weight path (default, native MXU): loosened tolerance.
    out_bf16 = jax.block_until_ready(bbox_model_forward(x, params))
    np.testing.assert_allclose(np.asarray(out_bf16), np.asarray(ref),
                               rtol=5e-2, atol=2e-2)

    # uncond path (no kernel needed: returns the learned null embedding)
    _ = jax.block_until_ready(bbox_model_forward(None, params, uncond=True))

    print("KERNEL_OK")
</pallas_src>

<mosaic_0001>
module attributes {stable_mosaic.version = 11 : i64} {
  func.func @bbox_kernel(%arg0: i32, %arg1: memref<16x3xf32, #tpu.memory_space<vmem>>, %arg2: memref<3x15xf32, #tpu.memory_space<vmem>>, %arg3: memref<15x128xf32, #tpu.memory_space<vmem>>, %arg4: memref<15x128xf32, #tpu.memory_space<vmem>>, %arg5: memref<3x128xf32, #tpu.memory_space<vmem>>, %arg6: memref<1x128xf32, #tpu.memory_space<vmem>>, %arg7: memref<128x128xf32, #tpu.memory_space<vmem>>, %arg8: memref<1x128xf32, #tpu.memory_space<vmem>>, %arg9: memref<16x128xf32, #tpu.memory_space<vmem>>) attributes {dimension_semantics = [#tpu.dimension_semantics<parallel>], iteration_bounds = array<i64: 1>, scalar_prefetch = 0 : i64, scratch_operands = 0 : i64, tpu.core_type = #tpu.core_type<tc>, window_params = [{transform_indices = @transform_0, window_bounds = array<i64: 16, 3>}, {pipeline_mode = #tpu.pipeline_mode<synchronous>, transform_indices = @transform_1, window_bounds = array<i64: 3, 15>}, {pipeline_mode = #tpu.pipeline_mode<synchronous>, transform_indices = @transform_2, window_bounds = array<i64: 15, 128>}, {pipeline_mode = #tpu.pipeline_mode<synchronous>, transform_indices = @transform_3, window_bounds = array<i64: 15, 128>}, {pipeline_mode = #tpu.pipeline_mode<synchronous>, transform_indices = @transform_4, window_bounds = array<i64: 3, 128>}, {pipeline_mode = #tpu.pipeline_mode<synchronous>, transform_indices = @transform_5, window_bounds = array<i64: 1, 128>}, {pipeline_mode = #tpu.pipeline_mode<synchronous>, transform_indices = @transform_6, window_bounds = array<i64: 128, 128>}, {pipeline_mode = #tpu.pipeline_mode<synchronous>, transform_indices = @transform_7, window_bounds = array<i64: 1, 128>}, {transform_indices = @transform_8, window_bounds = array<i64: 16, 128>}]} {
    %c0 = arith.constant 0 : index
    %c0_0 = arith.constant 0 : index
    %0 = vector.load %arg1[%c0, %c0_0] : memref<16x3xf32, #tpu.memory_space<vmem>>, vector<16x3xf32>
    %cst = arith.constant dense<0.000000e+00> : vector<16xf32>
    %1 = vector.multi_reduction <add>, %0, %cst [1] : vector<16x3xf32> to vector<16xf32>
    %2 = vector.shape_cast %1 : vector<16xf32> to vector<16x1xf32>
    %3 = vector.broadcast %2 : vector<16x1xf32> to vector<16x3xf32>
    %4 = arith.divf %0, %3 : vector<16x3xf32>
    %c0_1 = arith.constant 0 : index
    %c0_2 = arith.constant 0 : index
    %5 = vector.load %arg2[%c0_1, %c0_2] : memref<3x15xf32, #tpu.memory_space<vmem>>, vector<3x15xf32>
    %cst_3 = arith.constant dense<0.000000e+00> : vector<16x15xf32>
    %6 = tpu.matmul %4, %5, %cst_3 {dimension_numbers = #tpu.dot_dimension_numbers<[1], [0], [0], [1], [0, 0, 1, 1], [], []>} : vector<16x3xf32>, vector<3x15xf32>, vector<16x15xf32> -> vector<16x15xf32>
    %7 = math.sin %6 : vector<16x15xf32>
    %8 = math.cos %6 : vector<16x15xf32>
    %c0_4 = arith.constant 0 : index
    %c0_5 = arith.constant 0 : index
    %9 = vector.load %arg3[%c0_4, %c0_5] : memref<15x128xf32, #tpu.memory_space<vmem>>, vector<15x128xf32>
    %cst_6 = arith.constant dense<0.000000e+00> : vector<16x128xf32>
    %10 = tpu.matmul %7, %9, %cst_6 {dimension_numbers = #tpu.dot_dimension_numbers<[1], [0], [0], [1], [0, 0, 1, 1], [], []>} : vector<16x15xf32>, vector<15x128xf32>, vector<16x128xf32> -> vector<16x128xf32>
    %c0_7 = arith.constant 0 : index
    %c0_8 = arith.constant 0 : index
    %11 = vector.load %arg4[%c0_7, %c0_8] : memref<15x128xf32, #tpu.memory_space<vmem>>, vector<15x128xf32>
    %cst_9 = arith.constant dense<0.000000e+00> : vector<16x128xf32>
    %12 = tpu.matmul %8, %11, %cst_9 {dimension_numbers = #tpu.dot_dimension_numbers<[1], [0], [0], [1], [0, 0, 1, 1], [], []>} : vector<16x15xf32>, vector<15x128xf32>, vector<16x128xf32> -> vector<16x128xf32>
    %13 = arith.addf %10, %12 : vector<16x128xf32>
    %c0_10 = arith.constant 0 : index
    %c0_11 = arith.constant 0 : index
    %14 = vector.load %arg5[%c0_10, %c0_11] : memref<3x128xf32, #tpu.memory_space<vmem>>, vector<3x128xf32>
    %cst_12 = arith.constant dense<0.000000e+00> : vector<16x128xf32>
    %15 = tpu.matmul %4, %14, %cst_12 {dimension_numbers = #tpu.dot_dimension_numbers<[1], [0], [0], [1], [0, 0, 1, 1], [], []>} : vector<16x3xf32>, vector<3x128xf32>, vector<16x128xf32> -> vector<16x128xf32>
    %16 = arith.addf %13, %15 : vector<16x128xf32>
    %c0_13 = arith.constant 0 : index
    %c0_14 = arith.constant 0 : index
    %17 = vector.load %arg6[%c0_13, %c0_14] : memref<1x128xf32, #tpu.memory_space<vmem>>, vector<1x128xf32>
    %18 = vector.broadcast %17 : vector<1x128xf32> to vector<16x128xf32>
    %19 = arith.addf %16, %18 : vector<16x128xf32>
    %cst_15 = arith.constant 0.000000e+00 : f32
    %20 = vector.broadcast %cst_15 : f32 to vector<16x128xf32>
    %21 = arith.maximumf %19, %20 : vector<16x128xf32>
    %c0_16 = arith.constant 0 : index
    %c0_17 = arith.constant 0 : index
    %22 = vector.load %arg7[%c0_16, %c0_17] : memref<128x128xf32, #tpu.memory_space<vmem>>, vector<128x128xf32>
    %cst_18 = arith.constant dense<0.000000e+00> : vector<16x128xf32>
    %23 = tpu.matmul %21, %22, %cst_18 {dimension_numbers = #tpu.dot_dimension_numbers<[1], [0], [0], [1], [0, 0, 1, 1], [], []>} : vector<16x128xf32>, vector<128x128xf32>, vector<16x128xf32> -> vector<16x128xf32>
    %c0_19 = arith.constant 0 : index
    %c0_20 = arith.constant 0 : index
    %24 = vector.load %arg8[%c0_19, %c0_20] : memref<1x128xf32, #tpu.memory_space<vmem>>, vector<1x128xf32>
    %25 = vector.broadcast %24 : vector<1x128xf32> to vector<16x128xf32>
    %26 = arith.addf %23, %25 : vector<16x128xf32>
    %c0_21 = arith.constant 0 : index
    %c0_22 = arith.constant 0 : index
    %27 = vector.load %arg9[%c0_21, %c0_22] : memref<16x128xf32, #tpu.memory_space<vmem>>, vector<16x128xf32>
    tpu.vector_store %arg9[%c0_21, %c0_22], %26 {strides = array<i32>} : memref<16x128xf32, #tpu.memory_space<vmem>>, vector<16x128xf32>,
    return
  }
  func.func @transform_0(%arg0: i32) -> (i32, i32) {
    %c0_i32 = arith.constant 0 : i32
    %c0_i32_0 = arith.constant 0 : i32
    return %arg0, %c0_i32 : i32, i32
  }
  func.func @transform_1(%arg0: i32) -> (i32, i32) {
    %c0_i32 = arith.constant 0 : i32
    %c0_i32_0 = arith.constant 0 : i32
    %c0_i32_1 = arith.constant 0 : i32
    return %c0_i32, %c0_i32_0 : i32, i32
  }
  func.func @transform_2(%arg0: i32) -> (i32, i32) {
    %c0_i32 = arith.constant 0 : i32
    %c0_i32_0 = arith.constant 0 : i32
    %c0_i32_1 = arith.constant 0 : i32
    return %c0_i32, %c0_i32_0 : i32, i32
  }
  func.func @transform_3(%arg0: i32) -> (i32, i32) {
    %c0_i32 = arith.constant 0 : i32
    %c0_i32_0 = arith.constant 0 : i32
    %c0_i32_1 = arith.constant 0 : i32
    return %c0_i32, %c0_i32_0 : i32, i32
  }
  func.func @transform_4(%arg0: i32) -> (i32, i32) {
    %c0_i32 = arith.constant 0 : i32
    %c0_i32_0 = arith.constant 0 : i32
    %c0_i32_1 = arith.constant 0 : i32
    return %c0_i32, %c0_i32_0 : i32, i32
  }
  func.func @transform_5(%arg0: i32) -> (i32, i32) {
    %c0_i32 = arith.constant 0 : i32
    %c0_i32_0 = arith.constant 0 : i32
    %c0_i32_1 = arith.constant 0 : i32
    return %c0_i32, %c0_i32_0 : i32, i32
  }
  func.func @transform_6(%arg0: i32) -> (i32, i32) {
    %c0_i32 = arith.constant 0 : i32
    %c0_i32_0 = arith.constant 0 : i32
    %c0_i32_1 = arith.constant 0 : i32
    return %c0_i32, %c0_i32_0 : i32, i32
  }
  func.func @transform_7(%arg0: i32) -> (i32, i32) {
    %c0_i32 = arith.constant 0 : i32
    %c0_i32_0 = arith.constant 0 : i32
    %c0_i32_1 = arith.constant 0 : i32
    return %c0_i32, %c0_i32_0 : i32, i32
  }
  func.func @transform_8(%arg0: i32) -> (i32, i32) {
    %c0_i32 = arith.constant 0 : i32
    %c0_i32_0 = arith.constant 0 : i32
    return %arg0, %c0_i32 : i32, i32
  }
}

</mosaic_0001>

<bundles_post_ra>
// kernel: tpu_custom_call.1
= control target key start
LH: loop header
LB: loop body
LE: loop exit
PB: predicated region body
PF: predicated region fallthrough
CT: control target
= control target key end

     0   :  { %13 = vsyncpa [#allocation3], 0  ;;  %s1471_s0 = inlined_call_operand.vmem [shape: f32[16,3], index: 0, kind: input, shape index: {}]   ;;  %s1472_s1 = inlined_call_operand.vmem [shape: f32[3,15], index: 1, kind: input, shape index: {}]   ;;  %s1473_s2 = inlined_call_operand.vmem [shape: f32[15,128], index: 2, kind: input, shape index: {}]   ;;  %s1474_s3 = inlined_call_operand.hbm [shape: f32[15,128], index: 3, kind: input, shape index: {}]   ;;  %s1475_s4 = inlined_call_operand.vmem [shape: f32[3,128], index: 4, kind: input, shape index: {}]   ;;  %s1476_s5 = inlined_call_operand.vmem [shape: f32[1,128], index: 5, kind: input, shape index: {}]   ;;  %s1477_s6 = inlined_call_operand.hbm [shape: f32[128,128], index: 6, kind: input, shape index: {}]   ;;  %s1478_s7 = inlined_call_operand.vmem [shape: f32[1,128], index: 7, kind: input, shape index: {}]   ;;  %s1479_s8 = inlined_call_operand.hbm [shape: f32[16,128], index: 8, kind: output, shape index: {}]  }
   0x1   :  { %14 = vsyncpa [#allocation6], 0 }
   0x2   :  { %15 = vsyncpa [#allocation4], 0  ;;  %s1228_s27 = smov [#allocation2]   ;;  %s1156_s9 = scalar_lea.hbm %s1474_s3, 256 }
   0x3   :  { %s27_s28 = sshll.u32 %s1228_s27, 4  ;;  %p1157_p0 = scmp.ne.s32.totalorder %s1474_s3, %s1156_s9  ;;  %s28_s28 = int_to_ptr.vmem [resolvable:$true] %s27_s28 }
   0x4   :  { %p1160_p1 = scmp.lt.u32.totalorder %s1156_s9, %s1474_s3 }
   0x6   :  { %p1162_p2 = pnand %p1160_p1, %p1157_p0 }
   0x8   :  { %1165 = shalt.err (!%p1162_p2)
}
   0x9   :  { %s1166_s14 = scalar_lea.vmem %s28_s28, 256  ;;  %p1171_p4 = scmp.lt.s32.totalorder %s28_s28, %s28_s28 }
   0xa   :  { %p1167_p3 = scmp.ne.s32.totalorder %s28_s28, %s1166_s14  ;;  %p1172_p5 = scmp.lt.s32.totalorder %s1166_s14, %s1166_s14 }
   0xc   :  { %p1173_p6 = por %p1172_p5, %p1171_p4 }
   0xe   :  { %p1174_p7 = pnand %p1173_p6, %p1167_p3 }
  0x10   :  { %1177 = shalt.err (!%p1174_p7)
}
  0x11   :  { %s1229_s15 = smov 128   ;;  %s1230_s16 = smov 8  }
  0x12   :  { %33 = dma.hbm_to_vmem [thread:$0]  %s1474_s3, 256, %s28_s28, [#allocation3], %s1229_s15, %s1229_s15, %s1230_s16  }
  0x13   :  { %s1231_s19 = smov [#allocation5]   ;;  %s1178_s23 = scalar_lea.hbm %s1477_s6, 2048 }
  0x14   :  { %s43_s20 = sshll.u32 %s1231_s19, 4  ;;  %p1179_p8 = scmp.ne.s32.totalorder %s1477_s6, %s1178_s23  ;;  %s44_s20 = int_to_ptr.vmem [resolvable:$true] %s43_s20 }
  0x15   :  { %p1182_p9 = scmp.lt.u32.totalorder %s1178_s23, %s1477_s6 }
  0x17   :  { %p1184_p10 = pnand %p1182_p9, %p1179_p8 }
  0x19   :  { %1187 = shalt.err (!%p1184_p10)
}
  0x1a   :  { %s1188_s29 = scalar_lea.vmem %s44_s20, 2048  ;;  %p1193_p12 = scmp.lt.s32.totalorder %s44_s20, %s44_s20 }
  0x1b   :  { %p1189_p11 = scmp.ne.s32.totalorder %s44_s20, %s1188_s29  ;;  %p1194_p13 = scmp.lt.s32.totalorder %s1188_s29, %s1188_s29 }
  0x1d   :  { %p1195_p0 = por %p1194_p13, %p1193_p12 }
  0x1f   :  { %p1196_p1 = pnand %p1195_p0, %p1189_p11 }
  0x21   :  { %1199 = shalt.err (!%p1196_p1)
}
  0x22   :  { %49 = dma.hbm_to_vmem [thread:$0]  %s1477_s6, 2048, %s44_s20, [#allocation6], %s1229_s15, %s1229_s15, %s1230_s16  }
  0x23   :  { %1222 = dma.done.wait [#allocation3], 256  }
  0x24   :  { %1223 = vsyncadd [#allocation3], 4294967040 }
  0x25   :  { %1224 = dma.done.wait [#allocation6], 2048  }
  0x26   :  { %1225 = vsyncadd [#allocation6], 4294965248  ;;  %vm60_vm0 = vcmask 23552   ;;  %v58_v0 = vld [vmem:[%s1471_s0] sm:$0xff]  ;;  %v59_v1 = vld [vmem:[%s1471_s0 + $0x8] sm:$0xff]  ;;  %vm78_vm1 = vcmask 1042432  }
  0x27   :  { %v61_v2 = vsel %vm60_vm0, %v58_v0, 0.0  ;;  %v64_v3 = vsel %vm60_vm0, %v59_v1, 0.0  ;;  %v71_v4 = vld [vmem:[%s1472_s1] sm:$0x7]  ;;  %v573_v11 = vld [vmem:[#allocation2] sm:$0xff]  ;;  %vm582_vm2 = vcmask 1046528  }
  0x28   :  { %62 = vadd.xlane.f32.xlu0 %v61_v2  ;;  %1017 = vmatprep.subr.msk.mxu1 %vm78_vm1, %v71_v4  ;;  %v574_v12 = vld [vmem:[#allocation2 + $0x8] sm:$0x7f]  ;;  %vm1232_vm3 = vmmov 1   ;;  %v571_v15 = vld [vmem:[%s1473_s2] sm:$0xff]  ;;  %v572_v16 = vld [vmem:[%s1473_s2 + $0x8] sm:$0x7f] }
  0x29   :  { %1018 = vmatpush3.msk.msra.mxu1 %vm78_vm1, %v71_v4  ;;  %v1076_v13 = vpack.c.bf16 %v574_v12, %v573_v11  ;;  %vm1336_vm4 = vmpackc.low %vm582_vm2, %vm1232_vm3  ;;  %v1350_v17 = vpack.c.bf16 %v572_v16, %v571_v15  ;;  %v837_v18 = vld [vmem:[#allocation5] sm:$0xff]  ;;  %v838_v19 = vld [vmem:[#allocation5 + $0x8] sm:$0xff]  ;;  %v1233_v61 = vmov 683565275   ;;  %s1239_s21 = smov [#allocation7]  }
  0x2a   :  { %v839_v20 = vld [vmem:[#allocation5 + $0x10] sm:$0xff]  ;;  %v1088_v21 = vpack.c.bf16 %v838_v19, %v837_v18  ;;  %v840_v22 = vld [vmem:[#allocation5 + $0x18] sm:$0xff]  ;;  %v841_v24 = vld [vmem:[#allocation5 + $0x20] sm:$0xff]  ;;  %v1238_v18 = vmov 1326507024   ;;  %s942_s22 = sshll.u32 %s1239_s21, 4  ;;  %s943_s22 = int_to_ptr.vmem [resolvable:$true] %s942_s22 }
  0x2b   :  { %1078 = vmatprep.subr.msk.bf16.mxu1 %vm1336_vm4, %v1076_v13  ;;  %v1092_v23 = vpack.c.bf16 %v840_v22, %v839_v20  ;;  %v842_v25 = vld [vmem:[#allocation5 + $0x28] sm:$0xff]  ;;  %v843_v27 = vld [vmem:[#allocation5 + $0x30] sm:$0xff]  ;;  %v844_v28 = vld [vmem:[#allocation5 + $0x38] sm:$0xff]  ;;  %p1205_p3 = scmp.lt.s32.totalorder %s943_s22, %s943_s22 }
  0x2c   :  { %65 = vadd.xlane.f32.xlu0 %v64_v3  ;;  %1089 = vmatprep.subr.bf16.mxu0 %v1088_v21  ;;  %v1096_v26 = vpack.c.bf16 %v842_v25, %v841_v24  ;;  %v1100_v29 = vpack.c.bf16 %v844_v28, %v843_v27  ;;  %v845_v30 = vld [vmem:[#allocation5 + $0x40] sm:$0xff]  ;;  %v846_v31 = vld [vmem:[#allocation5 + $0x48] sm:$0xff]  ;;  %v847_v33 = vld [vmem:[#allocation5 + $0x50] sm:$0xff]  ;;  %v1235_v3 = vmov 2131351028  }
  0x2d   :  { %1091 = vmatpush3.bf16.msra.mxu0 %v1088_v21  ;;  %v1104_v32 = vpack.c.bf16 %v846_v31, %v845_v30  ;;  %v848_v34 = vld [vmem:[#allocation5 + $0x58] sm:$0xff]  ;;  %v849_v36 = vld [vmem:[#allocation5 + $0x60] sm:$0xff]  ;;  %v850_v37 = vld [vmem:[#allocation5 + $0x68] sm:$0xff] }
  0x2e   :  { %1093 = vmatprep.subr.bf16.mxu0 %v1092_v23  ;;  %v1108_v35 = vpack.c.bf16 %v848_v34, %v847_v33  ;;  %v1112_v43 = vpack.c.bf16 %v850_v37, %v849_v36  ;;  %v851_v14 = vld [vmem:[#allocation5 + $0x70] sm:$0xff] }
  0x31   :  { %1095 = vmatpush3.bf16.msra.mxu0 %v1092_v23 }
  0x32   :  { %1097 = vmatprep.subr.bf16.mxu0 %v1096_v26 }
  0x35   :  { %1099 = vmatpush3.bf16.msra.mxu0 %v1096_v26 }
  0x36   :  { %1101 = vmatprep.subr.bf16.mxu0 %v1100_v29 }
  0x39   :  { %1103 = vmatpush3.bf16.msra.mxu0 %v1100_v29 }
  0x3a   :  { %1105 = vmatprep.subr.bf16.mxu0 %v1104_v32 }
  0x3d   :  { %1107 = vmatpush3.bf16.msra.mxu0 %v1104_v32 }
  0x3e   :  { %1109 = vmatprep.subr.bf16.mxu0 %v1108_v35 }
  0x41   :  { %1111 = vmatpush3.bf16.msra.mxu0 %v1108_v35 }
  0x42   :  { %1113 = vmatprep.subr.bf16.mxu0 %v1112_v43 }
  0x45   :  { %1115 = vmatpush3.bf16.msra.mxu0 %v1112_v43 }
  0xb5   :  { %v63_v5 = vpop.xlane.xlu0 %62 }
  0xb6   :  { %1144 = vrcp.f32 %v63_v5  ;;  %v1236_v5 = vmov 2102212464  }
  0xb9   :  { %v66_v6 = vpop.xlane.xlu0 %65 }
  0xba   :  { %1146 = vrcp.f32 %v66_v6 }
  0xc0   :  { %v1145_v7 = vpop.eup %1144 }
  0xc1   :  { %v1328_v8 = vmul.f32 %v1145_v7, %v58_v0  ;;  %v1237_v7 = vmov 920167782  }
  0xc3   :  { %1019 = vmatprep.mubr.msk.f32.mxu1 %vm60_vm0, %v1328_v8 }
  0xc4   :  { %v1147_v9 = vpop.eup %1146 }
  0xc5   :  { %v1332_v10 = vmul.f32 %v1147_v9, %v59_v1  ;;  %v1234_v1 = vmov 2475754826  }
  0xc7   :  { %1020 = vmatmul.mubr.msk.f32.vlgmr.msra.gmra.mrb[0].mxu1 %vm60_vm0, %v1332_v10 }
  0xc8   :  { %1081 = vmatpush3.bf16.msk.msra.mxu1 %vm1336_vm4, %v1076_v13 }
  0xc9   :  { %1084 = vmatprep.subr.msk.bf16.mxu1 %vm1336_vm4, %v1350_v17 }
 0x19a   :  { %v1355_v38 = vpop.f32.mrb[0].mxu1 }
 0x19b   :  { %v261_v39 = vand.u32 2147483647, %v1355_v38  ;;  %v264_v40 = vand.u32 2139095040, %v1355_v38  ;;  %v1359_v41 = vpop.f32.mrb[1].mxu1 }
 0x19c   :  { %v160_v42 = vand.u32 2139095040, %v1359_v41  ;;  %v157_v46 = vand.u32 2147483647, %v1359_v41 }
 0x19d   :  { %v265_v44 = vshrl.u32 %v264_v40, 23  ;;  %v268_v45 = vand.u32 8388607, %v261_v39 }
 0x19e   :  { %v161_v47 = vshrl.u32 %v160_v42, 23  ;;  %v1367_v52 = vand.u32 8388607, %v157_v46 }
 0x19f   :  { %v962_v48 = vadd.s32 4294967169, %v265_v44  ;;  %v269_v51 = vor.u32 8388608, %v268_v45 }
 0x1a0   :  { %v958_v49 = vadd.s32 4294967169, %v161_v47  ;;  %v165_v59 = vor.u32 8388608, %v1367_v52 }
 0x1a1   :  { %v271_v50 = vadd.s32 1, %v962_v48  ;;  %v1369_v58 = vshll.u32 %v269_v51, 8 }
 0x1a2   :  { %v167_v53 = vadd.s32 1, %v958_v49 }
 0x1a3   :  { %vm272_vm5 = vcmp.gt.s32.totalorder %v271_v50, 0 }
 0x1a4   :  { %v273_v54 = vsel %vm272_vm5, %v271_v50, 0  ;;  %vm168_vm6 = vcmp.gt.s32.totalorder %v167_v53, 0 }
 0x1a5   :  { %v274_v55 = vshrl.u32 %v273_v54, 5  ;;  %v275_v56 = vand.u32 31, %v273_v54  ;;  %v169_v57 = vsel %vm168_vm6, %v167_v53, 0  ;;  %vm263_vm6 = vcmp.lt.s32.totalorder %v1355_v38, 0 }
 0x1a6   :  { %v1372_v63 = vshrl.u32 %v169_v57, 5  ;;  %v171_v0 = vand.u32 31, %v169_v57 }
 0x1a7   :  { %v276_v60 = vsub.s32 32, %v275_v56  ;;  %v278_v62 = vshll.u32 %v1233_v61, %v275_v56  ;;  %v281_v2 = vshll.u32 %v1234_v1, %v275_v56  ;;  %v284_v4 = vshll.u32 %v1235_v3, %v275_v56 }
 0x1a8   :  { %v287_v6 = vshll.u32 %v1236_v5, %v275_v56  ;;  %v290_v9 = vshll.u32 %v1237_v7, %v275_v56  ;;  %vm293_vm7 = vcmp.lt.s32.totalorder %v274_v55, 1  ;;  %vm294_vm8 = vcmp.lt.s32.totalorder %v274_v55, 2 }
 0x1a9   :  { %v279_v11 = vshrl.u32 %v1234_v1, %v276_v60  ;;  %v282_v12 = vshrl.u32 %v1235_v3, %v276_v60  ;;  %v285_v13 = vshrl.u32 %v1236_v5, %v276_v60  ;;  %v277_v15 = vshrl.u32 %v1233_v61, %v276_v60 }
 0x1aa   :  { %v288_v16 = vshrl.u32 %v1237_v7, %v276_v60  ;;  %v291_v19 = vshrl.u32 %v1238_v18, %v276_v60  ;;  %v172_v23 = vsub.s32 32, %v171_v0  ;;  %vm295_vm9 = vcmp.lt.s32.totalorder %v274_v55, 3 }
 0x1ab   :  { %v280_v20 = vor.u32 %v279_v11, %v278_v62  ;;  %v283_v21 = vor.u32 %v282_v12, %v281_v2  ;;  %v286_v22 = vor.u32 %v285_v13, %v284_v4  ;;  %vm296_vm10 = vcmp.lt.s32.totalorder %v274_v55, 4 }
 0x1ac   :  { %v289_v24 = vor.u32 %v288_v16, %v287_v6  ;;  %v292_v25 = vor.u32 %v291_v19, %v290_v9  ;;  %v174_v33 = vshll.u32 %v1233_v61, %v171_v0  ;;  %v175_v36 = vshrl.u32 %v1234_v1, %v172_v23 }
 0x1ad   :  { %v297_v26 = vsel %vm293_vm7, %v277_v15, %v280_v20  ;;  %v298_v27 = vsel %vm296_vm10, %v286_v22, 2102212464  ;;  %v301_v28 = vsel %vm293_vm7, %v280_v20, %v283_v21  ;;  %v305_v29 = vsel %vm293_vm7, %v283_v21, %v286_v22 }
 0x1ae   :  { %v299_v30 = vsel %vm295_vm9, %v283_v21, %v298_v27  ;;  %v302_v31 = vsel %vm296_vm10, %v289_v24, 920167782  ;;  %v306_v32 = vsel %vm296_vm10, %v292_v25, 1326507024  ;;  %v177_v37 = vshll.u32 %v1234_v1, %v171_v0 }
 0x1af   :  { %v303_v34 = vsel %vm295_vm9, %v286_v22, %v302_v31  ;;  %v307_v35 = vsel %vm295_vm9, %v289_v24, %v306_v32  ;;  %v300_v40 = vsel %vm294_vm8, %v297_v26, %v299_v30  ;;  %v178_v44 = vshrl.u32 %v1235_v3, %v172_v23 }
 0x1b0   :  { %v304_v42 = vsel %vm294_vm8, %v301_v28, %v303_v34  ;;  %v308_v43 = vsel %vm294_vm8, %v305_v29, %v307_v35  ;;  %v176_v50 = vor.u32 %v175_v36, %v174_v33  ;;  %v180_v52 = vshll.u32 %v1235_v3, %v171_v0 }
 0x1b1   :  { %v1381_v45 = vmul.u32.u64.low %v1369_v58, %v308_v43  ;;  %v1382_v47 = vmul.u32.u64.high %v1369_v58, %v308_v43, %v1381_v45  ;;  %v1385_v48 = vmul.u32.u64.low %v1369_v58, %v304_v42  ;;  %v1386_v49 = vmul.u32.u64.high %v1369_v58, %v304_v42, %v1385_v48 }
 0x1b2   :  { %v179_v51 = vor.u32 %v178_v44, %v177_v37  ;;  %v181_v53 = vshrl.u32 %v1236_v5, %v172_v23  ;;  %v183_v54 = vshll.u32 %v1236_v5, %v171_v0  ;;  %v184_v56 = vshrl.u32 %v1237_v7, %v172_v23 }
 0x1b3   :  { %v187_v57 = vshrl.u32 %v1238_v18, %v172_v23  ;;  %v205_v60 = vshll.u32 %v165_v59, 8  ;;  %v316_v55 = vmul.u32 %v1369_v58, %v300_v40  ;;  %v173_v62 = vshrl.u32 %v1233_v61, %v172_v23 }
 0x1b4   :  { %v182_v1 = vor.u32 %v181_v53, %v180_v52  ;;  %v186_v2 = vshll.u32 %v1237_v7, %v171_v0  ;;  %vm318_vm11 = vc.u32 %v1382_v47, %v1385_v48  ;;  %v319_v4 = vadd.s32 1, %v1386_v49 }
 0x1b5   :  { %v185_v6 = vor.u32 %v184_v56, %v183_v54  ;;  %vm189_vm12 = vcmp.lt.s32.totalorder %v1372_v63, 1  ;;  %vm191_vm13 = vcmp.lt.s32.totalorder %v1372_v63, 3  ;;  %vm192_vm14 = vcmp.lt.s32.totalorder %v1372_v63, 4 }
 0x1b6   :  { %v188_v9 = vor.u32 %v187_v57, %v186_v2  ;;  %v197_v3 = vsel %vm189_vm12, %v176_v50, %v179_v51  ;;  %v320_v59 = vsel %vm318_vm11, %v319_v4, %v1386_v49  ;;  %v194_v5 = vsel %vm192_vm14, %v182_v1, 2102212464 }
 0x1b7   :  { %v198_v58 = vsel %vm192_vm14, %v185_v6, 920167782  ;;  %v201_v61 = vsel %vm189_vm12, %v179_v51, %v182_v1  ;;  %v321_v11 = vadd.s32 %v320_v59, %v316_v55  ;;  %vm190_vm15 = vcmp.lt.s32.totalorder %v1372_v63, 2 }
 0x1b8   :  { %v199_v0 = vsel %vm191_vm13, %v182_v1, %v198_v58  ;;  %v202_v7 = vsel %vm192_vm14, %v188_v9, 1326507024  ;;  %v193_v12 = vsel %vm189_vm12, %v173_v62, %v176_v50  ;;  %v195_v13 = vsel %vm191_vm13, %v179_v51, %v194_v5 }
 0x1b9   :  { %v200_v15 = vsel %vm190_vm15, %v197_v3, %v199_v0  ;;  %v203_v16 = vsel %vm191_vm13, %v185_v6, %v202_v7  ;;  %v322_v18 = vadd.s32 536870912, %v321_v11  ;;  %v196_v25 = vsel %vm190_vm15, %v193_v12, %v195_v13 }
 0x1ba   :  { %v204_v19 = vsel %vm190_vm15, %v201_v61, %v203_v16  ;;  %v1396_v20 = vmul.u32.u64.low %v205_v60, %v200_v15  ;;  %v1397_v21 = vmul.u32.u64.high %v205_v60, %v200_v15, %v1396_v20  ;;  %v212_v27 = vmul.u32 %v205_v60, %v196_v25 }
 0x1bb   :  { %v1399_v22 = vmul.u32.u64.low %v205_v60, %v204_v19  ;;  %v1400_v23 = vmul.u32.u64.high %v205_v60, %v204_v19, %v1399_v22  ;;  %v1402_v24 = vshrl.u32 %v322_v18, 30  ;;  %v317_v44 = vadd.s32 %v1385_v48, %v1382_v47 }
 0x1bc   :  { %v215_v63 = vadd.s32 1, %v1397_v21  ;;  %vm1413_vm7 = vcmp.le.f32.partialorder %v261_v39, 0.7853982  ;;  %vm159_vm8 = vcmp.lt.s32.totalorder %v1359_v41, 0  ;;  %vm158_vm9 = vcmp.le.f32.partialorder %v157_v46, 0.7853982 }
 0x1bd   :  { %v324_v26 = vshll.u32 %v1402_v24, 30  ;;  %vm214_vm2 = vc.u32 %v1400_v23, %v1396_v20  ;;  %v213_v4 = vadd.s32 %v1396_v20, %v1400_v23  ;;  %v347_v19 = vsub.s32 4, %v1402_v24 }
 0x1be   :  { %v216_v29 = vsel %vm214_vm2, %v215_v63, %v1397_v21  ;;  %vm575_vm10 = vcmask 121856  }
 0x1bf   :  { %v325_v28 = vsub.s32 %v321_v11, %v324_v26  ;;  %v217_v30 = vadd.s32 %v216_v29, %v212_v27  ;;  %v348_v23 = vsel %vm263_vm6, %v347_v19, %v1402_v24 }
 0x1c0   :  { %v350_v63 = vsel %vm1413_vm7, 0, %v348_v23 }
 0x1c1   :  { %v327_v31 = vsub.s32 0, %v325_v28  ;;  %v218_v32 = vadd.s32 536870912, %v217_v30  ;;  %v354_v29 = vadd.s32 3, %v350_v63 }
 0x1c3   :  { %v963_v33 = vmin.u32 %v327_v31, %v325_v28  ;;  %v219_v34 = vshrl.u32 %v218_v32, 30 }
 0x1c5   :  { %v329_v35 = vclz %v963_v33  ;;  %v220_v36 = vshll.u32 %v219_v34, 30  ;;  %v243_v18 = vsub.s32 4, %v219_v34 }
 0x1c7   :  { %v964_v37 = vadd.s32 4294967294, %v329_v35  ;;  %v221_v40 = vsub.s32 %v217_v30, %v220_v36  ;;  %v244_v21 = vsel %vm159_vm8, %v243_v18, %v219_v34  ;;  %v561_v30 = vand.u32 3, %v350_v63 }
 0x1c8   :  { %v246_v25 = vsel %vm158_vm9, 0, %v244_v21  ;;  %v355_v35 = vand.u32 3, %v354_v29 }
 0x1c9   :  { %vm965_vm3 = vcmp.lt.s32.totalorder %v964_v37, 0  ;;  %v223_v43 = vsub.s32 0, %v221_v40  ;;  %v458_v32 = vand.u32 3, %v246_v25  ;;  %vm563_vm11 = vcmp.eq.s32.totalorder %v561_v30, 0 }
 0x1ca   :  { %v332_v42 = vsel %vm965_vm3, 0, %v964_v37  ;;  %vm566_vm12 = vcmp.eq.s32.totalorder %v561_v30, 2  ;;  %vm562_vm13 = vcmp.lt.s32.totalorder %v561_v30, 2 }
 0x1cb   :  { %v333_v45 = vsub.s32 32, %v332_v42  ;;  %v337_v49 = vsub.s32 4294967266, %v332_v42  ;;  %v959_v50 = vmin.u32 %v223_v43, %v221_v40  ;;  %v334_v51 = vshll.u32 %v325_v28, %v332_v42 }
 0x1cc   :  { %v250_v28 = vadd.s32 3, %v246_v25  ;;  %vm459_vm14 = vcmp.lt.s32.totalorder %v458_v32, 2  ;;  %vm463_vm15 = vcmp.eq.s32.totalorder %v458_v32, 2  ;;  %vm460_vm3 = vcmp.eq.s32.totalorder %v458_v32, 0 }
 0x1cd   :  { %v335_v52 = vshrl.u32 %v317_v44, %v333_v45  ;;  %v338_v53 = vadd.s32 127, %v337_v49  ;;  %v225_v54 = vclz %v959_v50 }
 0x1ce   :  { %v251_v33 = vand.u32 3, %v250_v28 }
 0x1cf   :  { %v336_v56 = vor.u32 %v335_v52, %v334_v51  ;;  %v339_v57 = vshll.u32 %v338_v53, 23  ;;  %v960_v60 = vadd.s32 4294967294, %v225_v54 }
 0x1d0   :  { %vm256_vm2 = vcmp.eq.s32.totalorder %v251_v33, 2 }
 0x1d1   :  { %v340_v55 = vor.u32 4788187, %v339_v57  ;;  %vm961_vm5 = vcmp.lt.s32.totalorder %v960_v60, 0  ;;  %v343_v1 = vcvt.s32.f32 %v336_v56  ;;  %v745_v56 = vld [vmem:[%s1475_s4] sm:$0x7] }
 0x1d2   :  { %v228_v2 = vsel %vm961_vm5, 0, %v960_v60  ;;  %vm253_vm5 = vcmp.eq.s32.totalorder %v251_v33, 0 }
 0x1d3   :  { %v341_v62 = vand.u32 2147483647, %v340_v55  ;;  %v229_v6 = vsub.s32 32, %v228_v2  ;;  %v233_v9 = vsub.s32 4294967266, %v228_v2  ;;  %v230_v48 = vshll.u32 %v221_v40, %v228_v2 }
 0x1d5   :  { %v344_v47 = vmul.f32 %v343_v1, %v341_v62  ;;  %v231_v3 = vshrl.u32 %v213_v4, %v229_v6  ;;  %v234_v59 = vadd.s32 127, %v233_v9  ;;  %v983_v1 = vld [vmem:[%s1476_s5] ss:$0 sm:$0xff]  ;;  %s1200_s5 = scalar_lea.vmem %s943_s22, 256 }
 0x1d6   :  { %p1201_p2 = scmp.ne.s32.totalorder %s943_s22, %s1200_s5  ;;  %p1206_p4 = scmp.lt.s32.totalorder %s1200_s5, %s1200_s5 }
 0x1d7   :  { %v345_v5 = vxor.u32 2147483648, %v344_v47  ;;  %v232_v58 = vor.u32 %v231_v3, %v230_v48  ;;  %v235_v61 = vshll.u32 %v234_v59, 23 }
 0x1d8   :  { %p1207_p5 = por %p1206_p4, %p1205_p3 }
 0x1d9   :  { %v346_v0 = vsel %vm263_vm6, %v345_v5, %v344_v47  ;;  %v236_v12 = vor.u32 4788187, %v235_v61  ;;  %v239_v15 = vcvt.s32.f32 %v232_v58  ;;  %vm252_vm6 = vcmp.lt.s32.totalorder %v251_v33, 2 }
 0x1da   :  { %v349_v7 = vsel %vm1413_vm7, %v1355_v38, %v346_v0  ;;  %vm249_vm7 = vweird.f32 %v1359_v41  ;;  %p1208_p6 = pnand %p1207_p5, %p1201_p2 }
 0x1db   :  { %v237_v13 = vand.u32 2147483647, %v236_v12  ;;  %1148 = vcosq.f32 %v349_v7 }
 0x1dc   :  { %1150 = vsinq.f32 %v349_v7 }
 0x1dd   :  { %v240_v16 = vmul.f32 %v239_v15, %v237_v13 }
 0x1df   :  { %v241_v39 = vxor.u32 2147483648, %v240_v16 }
 0x1e1   :  { %v242_v20 = vsel %vm159_vm8, %v241_v39, %v240_v16  ;;  %vm353_vm8 = vweird.f32 %v1355_v38 }
 0x1e2   :  { %v245_v22 = vsel %vm158_vm9, %v1359_v41, %v242_v20  ;;  %vm357_vm9 = vcmp.eq.s32.totalorder %v355_v35, 0 }
 0x1e3   :  { %1152 = vcosq.f32 %v245_v22 }
 0x1e4   :  { %1154 = vsinq.f32 %v245_v22 }
 0x1e5   :  { %v1149_v26 = vpop.eup %1148 }
 0x1e6   :  { %v1151_v27 = vpop.eup %1150  ;;  %v361_v31 = vxor.u32 2147483648, %v1149_v26 }
 0x1e7   :  { %v358_v46 = vxor.u32 2147483648, %v1151_v27 }
 0x1e8   :  { %v568_v40 = vsel %vm566_vm12, %v361_v31, %v1151_v27  ;;  %vm356_vm12 = vcmp.lt.s32.totalorder %v355_v35, 2 }
 0x1e9   :  { %v565_v37 = vsel %vm563_vm11, %v1149_v26, %v358_v46  ;;  %vm360_vm11 = vcmp.eq.s32.totalorder %v355_v35, 2  ;;  %v359_v41 = vsel %vm357_vm9, %v1149_v26, %v358_v46 }
 0x1ea   :  { %v569_v49 = vsel %vm562_vm13, %v565_v37, %v568_v40  ;;  %v362_v38 = vsel %vm360_vm11, %v361_v31, %v1151_v27 }
 0x1eb   :  { %v570_v54 = vsel %vm353_vm8, nan, %v569_v49  ;;  %v363_v60 = vsel %vm356_vm12, %v359_v41, %v362_v38 }
 0x1ec   :  { %v364_v55 = vsel %vm353_vm8, nan, %v363_v60 }
 0x1ed   :  { %v1153_v34 = vpop.eup %1152 }
 0x1ee   :  { %v1155_v24 = vpop.eup %1154  ;;  %v257_v36 = vxor.u32 2147483648, %v1153_v34 }
 0x1ef   :  { %v254_v42 = vxor.u32 2147483648, %v1155_v24 }
 0x1f0   :  { %v465_v43 = vsel %vm463_vm15, %v257_v36, %v1155_v24  ;;  %v258_v44 = vsel %vm256_vm2, %v257_v36, %v1155_v24 }
 0x1f1   :  { %v462_v45 = vsel %vm460_vm3, %v1153_v34, %v254_v42  ;;  %v255_v50 = vsel %vm253_vm5, %v1153_v34, %v254_v42 }
 0x1f2   :  { %v466_v51 = vsel %vm459_vm14, %v462_v45, %v465_v43  ;;  %v259_v52 = vsel %vm252_vm6, %v255_v50, %v258_v44 }
 0x1f3   :  { %v467_v53 = vsel %vm249_vm7, nan, %v466_v51  ;;  %v260_v57 = vsel %vm249_vm7, nan, %v259_v52 }
 0x1f4   :  { %1026 = vmatprep.mubr.msk.f32.mxu1 %vm575_vm10, %v467_v53 }
 0x1f5   :  { %1027 = vmatmul.mubr.msk.f32.vlgmr.msra.gmra.mrb[2].mxu1 %vm575_vm10, %v570_v54 }
 0x1f6   :  { %1087 = vmatpush3.bf16.msk.msra.mxu1 %vm1336_vm4, %v1350_v17  ;;  %1033 = vmatprep.mubr.msk.f32.mxu1 %vm575_vm10, %v260_v57  ;;  %v852_v17 = vld [vmem:[#allocation5 + $0x78] sm:$0xff] }
 0x1f7   :  { %1036 = vmatprep.subr.msk.mxu1 %vm78_vm1, %v745_v56  ;;  %v1116_v62 = vpack.c.bf16 %v852_v17, %v851_v14 }
 0x1f9   :  { %1117 = vmatprep.subr.bf16.mxu0 %v1116_v62 }
 0x1fa   :  { %1119 = vmatpush3.bf16.msra.mxu0 %v1116_v62 }
 0x1fd   :  { %1034 = vmatmul.mubr.msk.f32.vlgmr.msra.gmra.mrb[2].mxu1 %vm575_vm10, %v364_v55 }
 0x1fe   :  { %1037 = vmatpush3.msk.msra.mxu1 %vm78_vm1, %v745_v56  ;;  %1038 = vmatprep.mubr.msk.f32.mxu1 %vm60_vm0, %v1328_v8  ;;  %v984_v8 = vld [vmem:[%s1478_s7] ss:$0 sm:$0xff] }
 0x205   :  { %1039 = vmatmul.mubr.msk.f32.vlgmr.msra.gmra.mrb[2].mxu1 %vm60_vm0, %v1332_v10 }
 0x2d8   :  { %v1040_v2 = vpop.f32.mrb[2].mxu1 }
 0x2d9   :  { %v834_v4 = vadd.f32 %v1040_v2, %v983_v1  ;;  %v815_v6 = vpop.f32.mrb[3].mxu1 }
 0x2da   :  { %v833_v9 = vadd.f32 %v983_v1, %v815_v6 }
 0x2db   :  { %v836_v48 = vmax.f32 %v834_v4, 0.0 }
 0x2dc   :  { %v835_v47 = vmax.f32 %v833_v9, 0.0 }
 0x2de   :  { %1073 = vmatprep.mubr.f32.mxu0 %v835_v47 }
 0x2df   :  { %1074 = vmatmul.mubr.f32.vlgmr.msra.gmra.mrb[0].mxu0 %v836_v48 }
 0x3b2   :  { %v1075_v10 = vpop.f32.mrb[0].mxu0 }
 0x3b3   :  { %v932_v3 = vadd.f32 %v1075_v10, %v984_v8  ;;  %v926_v59 = vpop.f32.mrb[1].mxu0 }
 0x3b4   :  { %v927_v5 = vadd.f32 %v984_v8, %v926_v59 }
 0x3b5   :  { %936 = vst [vmem:[#allocation7 + $0x8] sm:$0xff] %v932_v3 }
 0x3b6   :  { %935 = vst [vmem:[#allocation7] sm:$0xff] %v927_v5 }
 0x3b7   :  { %1211 = shalt.err (!%p1208_p6)
}
 0x3b8   :  { %s1212_s7 = scalar_lea.hbm %s1479_s8, 256 }
 0x3b9   :  { %p1213_p7 = scmp.ne.s32.totalorder %s1479_s8, %s1212_s7  ;;  %p1216_p8 = scmp.lt.u32.totalorder %s1212_s7, %s1479_s8 }
 0x3bb   :  { %p1218_p9 = pnand %p1216_p8, %p1213_p7 }
 0x3bd   :  { %1221 = shalt.err (!%p1218_p9)
}
 0x3be   :  { %948 = dma.vmem_to_hbm [thread:$0]  %s943_s22, 256, %s1479_s8, [#allocation4], %s1229_s15, %s1229_s15, %s1230_s16  }
 0x3bf   :  { %1226 = dma.done.wait [#allocation4], 256  }
 0x3c0   :  { %1227 = vsyncadd [#allocation4], 4294967040 }
 0x3c1   :  { %952 = vsyncpa [#allocation3], 1 }
 0x3c2   :  { %953 = vsyncpa [#allocation6], 1 }
 0x3c3   :  { %954 = vsyncpa [#allocation4], 1 }

</bundles_post_ra>
